<compile_context>
chip_gen: v7x
topology: tpu7x:2x2x1
jax: 0.10.0
libtpu: 0.0.40
codegen_flags: <defaults>
</compile_context>

<pallas_src>
import functools

import jax
import jax.numpy as jnp
from jax import lax
from jax.experimental import pallas as pl
from jax.experimental.pallas import tpu as pltpu

BN_EPS = 1e-5


def _round_up(n, m):
    return ((n + m - 1) // m) * m


# ----------------------------- kernel helpers (traced inside the kernel) -----

def _mesh_conv(act, gmat, w, B, Ep):
    """MeshCNN MeshConv on (C, B*Ep) activations.

    act : (C, B*Ep)  bf16   column layout b*Ep + e, padded cols (e >= E) are 0
    gmat: (Ep, 5*Ep) bf16   fused gather+symmetrize matrix; column block k gives
                            [f0, f1+f3, f2+f4, f1-f3, f2-f4][k]
    w   : (O, 5*C)   bf16   fused (1,5)-conv weights, columns slot-major then channel
    returns (O, B*Ep) f32
    """
    C = act.shape[0]
    outs = []
    for b in range(B):                                  # B is small; static unroll
        a_b = act[:, b * Ep:(b + 1) * Ep]               # (C, Ep) aligned lane slice
        # one MXU matmul does the neighbour gather AND the linear symmetric combos
        g = jnp.dot(a_b, gmat, preferred_element_type=jnp.float32)     # (C, 5Ep) f32
        feat = jnp.concatenate(
            [g[:, 0:Ep],                                # f0
             g[:, Ep:2 * Ep],                           # f1 + f3
             g[:, 2 * Ep:3 * Ep],                       # f2 + f4
             jnp.abs(g[:, 3 * Ep:4 * Ep]),              # |f1 - f3|
             jnp.abs(g[:, 4 * Ep:5 * Ep])],             # |f2 - f4|
            axis=0).astype(jnp.bfloat16)                # (5C, Ep)
        # single fused channel-mix matmul, contraction 5C, f32 accumulation
        outs.append(jnp.dot(w, feat, preferred_element_type=jnp.float32))  # (O, Ep)
    return jnp.concatenate(outs, axis=1) if B > 1 else outs[0]            # (O, B*Ep)


def _bn_relu(h, gamma, beta, n_bn):
    """BatchNorm2d(relu(h)) in training mode (batch stats, biased variance).

    h: (O, B*Ep) f32 with padded columns/channels exactly 0 (so they do not
       perturb the sums); gamma/beta: (O, 1) f32; n_bn = B*E (real element count).
    One-pass statistics: sum and sum-of-squares, then fused scale/shift.
    """
    r = jnp.maximum(h, 0.0)
    s1 = jnp.sum(r, axis=1, keepdims=True)                       # (O, 1)
    s2 = jnp.sum(r * r, axis=1, keepdims=True)                   # (O, 1)
    mean = s1 * (1.0 / n_bn)
    var = s2 * (1.0 / n_bn) - mean * mean                        # biased, like torch
    scale = gamma * lax.rsqrt(var + BN_EPS)                      # (O, 1)
    shift = beta - mean * scale                                  # (O, 1)
    return r * scale + shift


# ----------------------------------- kernel ----------------------------------

def _mresconv_kernel(x_ref, g_ref, w0_ref, wsk_ref, gamma_ref, beta_ref, o_ref,
                     *, B, Ep, n_bn, skips):
    # x_ref    : (Cin_p, B*Ep)          bf16
    # g_ref    : (Ep, 5*Ep)             bf16   (precomputed in the wrapper, NOT here)
    # w0_ref   : (Cout_p, 5*Cin_p)      bf16
    # wsk_ref  : (skips, Cout_p, 5*Cout_p) bf16
    # gamma_ref/beta_ref: (skips, Cout_p, 1) f32
    # o_ref    : (Cout_p, B*Ep)         f32
    gmat = g_ref[...]                                   # hoisted: read once, reuse

    y = _mesh_conv(x_ref[...], gmat, w0_ref[...], B, Ep)          # conv0 -> (O, B*Ep)
    h = y                                                          # residual branch
    for i in range(skips):                                         # static unroll
        z = _bn_relu(h, gamma_ref[i], beta_ref[i], n_bn)
        h = _mesh_conv(z.astype(jnp.bfloat16), gmat, wsk_ref[i], B, Ep)
    o_ref[...] = jnp.maximum(h + y, 0.0)                           # relu(h + y)


# --------------------------------- wrapper ------------------------------------

def mresconv_forward(x, gemm_edges, w0, w_skips, gammas, betas):
    """x: (B, Cin, E, 1); gemm_edges: (E, 4) int32 (-1 = missing neighbour);
       w0: (Cout, Cin, 1, 5); w_skips: (skips, Cout, Cout, 1, 5);
       gammas/betas: (skips, Cout).  Returns (B, Cout, E, 1) float32."""
    B, Cin, E, _ = x.shape
    skips, Cout = gammas.shape

    Ep = _round_up(E, 128)          # lane-dense edge dim
    Cin_p = _round_up(Cin, 8)       # sublane-aligned channel dims
    Cout_p = _round_up(Cout, 8)

    # --- gather index table (5, E): row 0 = edge itself, rows 1..4 = neighbours ---
    gi = jnp.concatenate(
        [jnp.arange(E, dtype=jnp.int32)[None, :],
         gemm_edges.astype(jnp.int32).T], axis=0)                          # (5, E)
    gi_pad = jnp.full((5, Ep), -1, jnp.int32).at[:, :E].set(gi)            # (5, Ep)

    # --- fused gather + symmetrize matrix, precomputed OUTSIDE the kernel ---------
    # oh[k, j, e] = 1 iff gi[k, e] == j   (-1 / padded e -> all-zero column,
    # exactly MeshCNN's pad-row trick).  Entries of G are in {-1, 0, 1, 2}, so the
    # bf16 cast is exact and the gather result is bit-identical to f32.
    j = jnp.arange(Ep, dtype=jnp.int32)[None, :, None]                     # (1, Ep, 1)
    oh = (j == gi_pad[:, None, :]).astype(jnp.float32)                     # (5, Ep, Ep)
    G = jnp.stack([oh[0],                # f0 (self)
                   oh[1] + oh[3],        # f1 + f3
                   oh[2] + oh[4],        # f2 + f4
                   oh[1] - oh[3],        # f1 - f3  (abs taken in-kernel)
                   oh[2] - oh[4]],       # f2 - f4
                  axis=0)                                                  # (5, Ep, Ep)
    G = jnp.transpose(G, (1, 0, 2)).reshape(Ep, 5 * Ep).astype(jnp.bfloat16)

    # --- fused (1,5)-conv weights: (O, C, 1, 5) -> (Op, 5*Cp), slot-major columns --
    def _fuse_w(w, cin, cin_p, cout, cout_p):
        wk = jnp.transpose(w[:, :, 0, :], (0, 2, 1))           # (cout, 5, cin) [o,k,c]
        wk = jnp.pad(wk, ((0, cout_p - cout), (0, 0), (0, cin_p - cin)))
        return wk.reshape(cout_p, 5 * cin_p).astype(jnp.bfloat16)

    w0_k = _fuse_w(w0, Cin, Cin_p, Cout, Cout_p)                           # (Op, 5*Cin_p)
    wsk_k = jnp.stack([_fuse_w(w_skips[i], Cout, Cout_p, Cout, Cout_p)
                       for i in range(skips)], axis=0)                     # (skips, Op, 5*Op)

    gam = jnp.pad(gammas.astype(jnp.float32), ((0, 0), (0, Cout_p - Cout)),
                  constant_values=1.0).reshape(skips, Cout_p, 1)
    bet = jnp.pad(betas.astype(jnp.float32), ((0, 0), (0, Cout_p - Cout))
                  ).reshape(skips, Cout_p, 1)

    # --- activations: (Cin_p, B*Ep) bf16, edges on the lane axis, zero padded ------
    x_k = jnp.transpose(x[..., 0], (1, 0, 2))                              # (Cin, B, E)
    x_k = jnp.pad(x_k, ((0, Cin_p - Cin), (0, 0), (0, Ep - E)))
    x_k = x_k.reshape(Cin_p, B * Ep).astype(jnp.bfloat16)

    kernel = functools.partial(_mresconv_kernel, B=B, Ep=Ep,
                               n_bn=float(B * E), skips=skips)

    out = pl.pallas_call(
        kernel,
        out_shape=jax.ShapeDtypeStruct((Cout_p, B * Ep), jnp.float32),
        in_specs=[pl.BlockSpec(memory_space=pltpu.MemorySpace.VMEM)] * 6,
        out_specs=pl.BlockSpec(memory_space=pltpu.MemorySpace.VMEM),
        # Explicit VMEM budget (safe on v5e/v6e/v7x); re-derive if Ep is scaled up.
        compiler_params=pltpu.CompilerParams(vmem_limit_bytes=32 * 1024 * 1024),
    )(x_k, G, w0_k, wsk_k, gam, bet)

    out = out.reshape(Cout_p, B, Ep)[:Cout, :, :E]                         # strip pads
    return jnp.transpose(out, (1, 0, 2))[..., None]                        # (B, Cout, E, 1)


# ----------------------------- pure-JAX reference ------------------------------
# Implements the module semantics with the SAME mixed-precision policy as the
# kernel (bf16 matmul operands, f32 accumulation, f32 BatchNorm) so the check
# validates the gather / symmetric-feature / conv / BN / residual structure
# tightly.  A pure-f32 PyTorch forward differs from this only by O(bf16 eps).

def _mesh_conv_ref(act, gi, w):
    B, C, E = act.shape
    a = act.astype(jnp.bfloat16).astype(jnp.float32)                 # operand rounding
    ap = jnp.concatenate([jnp.zeros((B, C, 1), jnp.float32), a], axis=2)
    f = ap[:, :, gi.T + 1]                                           # (B, C, E, 5)
    f0, f1, f2, f3, f4 = [f[..., k] for k in range(5)]
    feat = jnp.stack([f0, f1 + f3, f2 + f4,
                      jnp.abs(f1 - f3), jnp.abs(f2 - f4)], axis=-1)
    feat = feat.astype(jnp.bfloat16).astype(jnp.float32)             # operand rounding
    wq = w[:, :, 0, :].astype(jnp.bfloat16).astype(jnp.float32)      # (O, C, 5)
    return jnp.einsum('bcek,ock->boe', feat, wq)


def _bn_relu_ref(h, gamma, beta):
    r = jnp.maximum(h, 0.0)
    mean = r.mean(axis=(0, 2), keepdims=True)
    var = (r * r).mean(axis=(0, 2), keepdims=True) - mean * mean
    return gamma.reshape(1, -1, 1) * (r - mean) * lax.rsqrt(var + BN_EPS) \
        + beta.reshape(1, -1, 1)


def mresconv_ref(x, gemm_edges, w0, w_skips, gammas, betas):
    E = gemm_edges.shape[0]
    gi = jnp.concatenate([jnp.arange(E, dtype=jnp.int32)[None, :],
                          gemm_edges.astype(jnp.int32).T], axis=0)
    xin = x[..., 0]
    y = _mesh_conv_ref(xin, gi, w0)
    h = y
    for i in range(w_skips.shape[0]):
        h = _bn_relu_ref(h, gammas[i], betas[i])
        h = _mesh_conv_ref(h, gi, w_skips[i])
    return jnp.maximum(h + y, 0.0)[..., None]


# ------------------------------------ main -------------------------------------

if __name__ == "__main__":
    B, Cin, Cout, E, skips = 2, 4, 8, 32, 1

    key = jax.random.PRNGKey(0)
    k_x, k_g, k_m, k_w0, k_w1 = jax.random.split(key, 5)

    x = jax.random.normal(k_x, (B, Cin, E, 1), dtype=jnp.float32)
    # synthetic deterministic mesh connectivity: 4 neighbour edges, some missing (-1)
    gemm = jax.random.randint(k_g, (E, 4), 0, E, dtype=jnp.int32)
    miss = jax.random.bernoulli(k_m, 0.1, (E, 4))
    gemm = jnp.where(miss, -1, gemm).astype(jnp.int32)

    # deterministic parameter init (module __init__ shapes; bias=False convs,
    # BatchNorm2d default gamma=1 / beta=0)
    w0 = 0.2 * jax.random.normal(k_w0, (Cout, Cin, 1, 5), dtype=jnp.float32)
    w_skips = 0.2 * jax.random.normal(k_w1, (skips, Cout, Cout, 1, 5), dtype=jnp.float32)
    gammas = jnp.ones((skips, Cout), jnp.float32)
    betas = jnp.zeros((skips, Cout), jnp.float32)

    out = jax.block_until_ready(mresconv_forward(x, gemm, w0, w_skips, gammas, betas))
    ref = mresconv_ref(x, gemm, w0, w_skips, gammas, betas)

    assert out.shape == (B, Cout, E, 1), out.shape
    err = float(jnp.max(jnp.abs(out - ref)))
    assert jnp.allclose(out, ref, rtol=1e-3, atol=1e-3), f"max abs err {err}"
    print("KERNEL_OK")
</pallas_src>

<mosaic_0001>
module attributes {stable_mosaic.version = 11 : i64} {
  func.func @_mresconv_kernel(%arg0: memref<8x256xbf16, #tpu.memory_space<vmem>>, %arg1: memref<128x640xbf16, #tpu.memory_space<vmem>>, %arg2: memref<8x40xbf16, #tpu.memory_space<vmem>>, %arg3: memref<1x8x40xbf16, #tpu.memory_space<vmem>>, %arg4: memref<1x8x1xf32, #tpu.memory_space<vmem>>, %arg5: memref<1x8x1xf32, #tpu.memory_space<vmem>>, %arg6: memref<8x256xf32, #tpu.memory_space<vmem>>) attributes {dimension_semantics = [], scalar_prefetch = 0 : i64, scratch_operands = 0 : i64, tpu.core_type = #tpu.core_type<tc>} {
    %c0 = arith.constant 0 : index
    %c0_0 = arith.constant 0 : index
    %0 = vector.load %arg1[%c0, %c0_0] : memref<128x640xbf16, #tpu.memory_space<vmem>>, vector<128x640xbf16>
    %c0_1 = arith.constant 0 : index
    %c0_2 = arith.constant 0 : index
    %1 = vector.load %arg0[%c0_1, %c0_2] : memref<8x256xbf16, #tpu.memory_space<vmem>>, vector<8x256xbf16>
    %c0_3 = arith.constant 0 : index
    %c0_4 = arith.constant 0 : index
    %2 = vector.load %arg2[%c0_3, %c0_4] : memref<8x40xbf16, #tpu.memory_space<vmem>>, vector<8x40xbf16>
    %3 = vector.extract_strided_slice %1 {offsets = [0, 0], sizes = [8, 128], strides = [1, 1]} : vector<8x256xbf16> to vector<8x128xbf16>
    %cst = arith.constant dense<0.000000e+00> : vector<8x640xf32>
    %4 = tpu.matmul %3, %0, %cst {dimension_numbers = #tpu.dot_dimension_numbers<[1], [0], [0], [1], [0, 0, 1, 1], [], []>} : vector<8x128xbf16>, vector<128x640xbf16>, vector<8x640xf32> -> vector<8x640xf32>
    %5 = vector.extract_strided_slice %4 {offsets = [0, 0], sizes = [8, 128], strides = [1, 1]} : vector<8x640xf32> to vector<8x128xf32>
    %6 = vector.extract_strided_slice %4 {offsets = [0, 128], sizes = [8, 128], strides = [1, 1]} : vector<8x640xf32> to vector<8x128xf32>
    %7 = vector.extract_strided_slice %4 {offsets = [0, 256], sizes = [8, 128], strides = [1, 1]} : vector<8x640xf32> to vector<8x128xf32>
    %8 = vector.extract_strided_slice %4 {offsets = [0, 384], sizes = [8, 128], strides = [1, 1]} : vector<8x640xf32> to vector<8x128xf32>
    %9 = math.absf %8 : vector<8x128xf32>
    %10 = vector.extract_strided_slice %4 {offsets = [0, 512], sizes = [8, 128], strides = [1, 1]} : vector<8x640xf32> to vector<8x128xf32>
    %11 = math.absf %10 : vector<8x128xf32>
    %12 = tpu.concatenate %5, %6, %7, %9, %11 in 0 : vector<8x128xf32>, vector<8x128xf32>, vector<8x128xf32>, vector<8x128xf32>, vector<8x128xf32> -> vector<40x128xf32>
    %13 = arith.truncf %12 : vector<40x128xf32> to vector<40x128xbf16>
    %cst_5 = arith.constant dense<0.000000e+00> : vector<8x128xf32>
    %14 = tpu.matmul %2, %13, %cst_5 {dimension_numbers = #tpu.dot_dimension_numbers<[1], [0], [0], [1], [0, 0, 1, 1], [], []>} : vector<8x40xbf16>, vector<40x128xbf16>, vector<8x128xf32> -> vector<8x128xf32>
    %15 = vector.extract_strided_slice %1 {offsets = [0, 128], sizes = [8, 128], strides = [1, 1]} : vector<8x256xbf16> to vector<8x128xbf16>
    %cst_6 = arith.constant dense<0.000000e+00> : vector<8x640xf32>
    %16 = tpu.matmul %15, %0, %cst_6 {dimension_numbers = #tpu.dot_dimension_numbers<[1], [0], [0], [1], [0, 0, 1, 1], [], []>} : vector<8x128xbf16>, vector<128x640xbf16>, vector<8x640xf32> -> vector<8x640xf32>
    %17 = vector.extract_strided_slice %16 {offsets = [0, 0], sizes = [8, 128], strides = [1, 1]} : vector<8x640xf32> to vector<8x128xf32>
    %18 = vector.extract_strided_slice %16 {offsets = [0, 128], sizes = [8, 128], strides = [1, 1]} : vector<8x640xf32> to vector<8x128xf32>
    %19 = vector.extract_strided_slice %16 {offsets = [0, 256], sizes = [8, 128], strides = [1, 1]} : vector<8x640xf32> to vector<8x128xf32>
    %20 = vector.extract_strided_slice %16 {offsets = [0, 384], sizes = [8, 128], strides = [1, 1]} : vector<8x640xf32> to vector<8x128xf32>
    %21 = math.absf %20 : vector<8x128xf32>
    %22 = vector.extract_strided_slice %16 {offsets = [0, 512], sizes = [8, 128], strides = [1, 1]} : vector<8x640xf32> to vector<8x128xf32>
    %23 = math.absf %22 : vector<8x128xf32>
    %24 = tpu.concatenate %17, %18, %19, %21, %23 in 0 : vector<8x128xf32>, vector<8x128xf32>, vector<8x128xf32>, vector<8x128xf32>, vector<8x128xf32> -> vector<40x128xf32>
    %25 = arith.truncf %24 : vector<40x128xf32> to vector<40x128xbf16>
    %cst_7 = arith.constant dense<0.000000e+00> : vector<8x128xf32>
    %26 = tpu.matmul %2, %25, %cst_7 {dimension_numbers = #tpu.dot_dimension_numbers<[1], [0], [0], [1], [0, 0, 1, 1], [], []>} : vector<8x40xbf16>, vector<40x128xbf16>, vector<8x128xf32> -> vector<8x128xf32>
    %27 = tpu.concatenate %14, %26 in 1 : vector<8x128xf32>, vector<8x128xf32> -> vector<8x256xf32>
    %c0_8 = arith.constant 0 : index
    %c0_9 = arith.constant 0 : index
    %c0_10 = arith.constant 0 : index
    %28 = vector.load %arg4[%c0_8, %c0_9, %c0_10] : memref<1x8x1xf32, #tpu.memory_space<vmem>>, vector<1x8x1xf32>
    %29 = vector.shape_cast %28 : vector<1x8x1xf32> to vector<8x1xf32>
    %c0_11 = arith.constant 0 : index
    %c0_12 = arith.constant 0 : index
    %c0_13 = arith.constant 0 : index
    %30 = vector.load %arg5[%c0_11, %c0_12, %c0_13] : memref<1x8x1xf32, #tpu.memory_space<vmem>>, vector<1x8x1xf32>
    %31 = vector.shape_cast %30 : vector<1x8x1xf32> to vector<8x1xf32>
    %cst_14 = arith.constant 0.000000e+00 : f32
    %32 = vector.broadcast %cst_14 : f32 to vector<8x256xf32>
    %33 = arith.maximumf %27, %32 : vector<8x256xf32>
    %cst_15 = arith.constant dense<0.000000e+00> : vector<8xf32>
    %34 = vector.multi_reduction <add>, %33, %cst_15 [1] : vector<8x256xf32> to vector<8xf32>
    %35 = vector.shape_cast %34 : vector<8xf32> to vector<8x1xf32>
    %36 = arith.mulf %33, %33 : vector<8x256xf32>
    %cst_16 = arith.constant dense<0.000000e+00> : vector<8xf32>
    %37 = vector.multi_reduction <add>, %36, %cst_16 [1] : vector<8x256xf32> to vector<8xf32>
    %38 = vector.shape_cast %37 : vector<8xf32> to vector<8x1xf32>
    %cst_17 = arith.constant 1.562500e-02 : f32
    %39 = vector.broadcast %cst_17 : f32 to vector<8x1xf32>
    %40 = arith.mulf %35, %39 : vector<8x1xf32>
    %cst_18 = arith.constant 1.562500e-02 : f32
    %41 = vector.broadcast %cst_18 : f32 to vector<8x1xf32>
    %42 = arith.mulf %38, %41 : vector<8x1xf32>
    %43 = arith.mulf %40, %40 : vector<8x1xf32>
    %44 = arith.subf %42, %43 : vector<8x1xf32>
    %cst_19 = arith.constant 9.99999974E-6 : f32
    %45 = vector.broadcast %cst_19 : f32 to vector<8x1xf32>
    %46 = arith.addf %44, %45 : vector<8x1xf32>
    %47 = math.rsqrt %46 : vector<8x1xf32>
    %48 = arith.mulf %29, %47 : vector<8x1xf32>
    %49 = arith.mulf %40, %48 : vector<8x1xf32>
    %50 = arith.subf %31, %49 : vector<8x1xf32>
    %51 = vector.broadcast %48 : vector<8x1xf32> to vector<8x256xf32>
    %52 = arith.mulf %33, %51 : vector<8x256xf32>
    %53 = vector.broadcast %50 : vector<8x1xf32> to vector<8x256xf32>
    %54 = arith.addf %52, %53 : vector<8x256xf32>
    %55 = arith.truncf %54 : vector<8x256xf32> to vector<8x256xbf16>
    %c0_20 = arith.constant 0 : index
    %c0_21 = arith.constant 0 : index
    %c0_22 = arith.constant 0 : index
    %56 = vector.load %arg3[%c0_20, %c0_21, %c0_22] : memref<1x8x40xbf16, #tpu.memory_space<vmem>>, vector<1x8x40xbf16>
    %57 = vector.shape_cast %56 : vector<1x8x40xbf16> to vector<8x40xbf16>
    %58 = vector.extract_strided_slice %55 {offsets = [0, 0], sizes = [8, 128], strides = [1, 1]} : vector<8x256xbf16> to vector<8x128xbf16>
    %cst_23 = arith.constant dense<0.000000e+00> : vector<8x640xf32>
    %59 = tpu.matmul %58, %0, %cst_23 {dimension_numbers = #tpu.dot_dimension_numbers<[1], [0], [0], [1], [0, 0, 1, 1], [], []>} : vector<8x128xbf16>, vector<128x640xbf16>, vector<8x640xf32> -> vector<8x640xf32>
    %60 = vector.extract_strided_slice %59 {offsets = [0, 0], sizes = [8, 128], strides = [1, 1]} : vector<8x640xf32> to vector<8x128xf32>
    %61 = vector.extract_strided_slice %59 {offsets = [0, 128], sizes = [8, 128], strides = [1, 1]} : vector<8x640xf32> to vector<8x128xf32>
    %62 = vector.extract_strided_slice %59 {offsets = [0, 256], sizes = [8, 128], strides = [1, 1]} : vector<8x640xf32> to vector<8x128xf32>
    %63 = vector.extract_strided_slice %59 {offsets = [0, 384], sizes = [8, 128], strides = [1, 1]} : vector<8x640xf32> to vector<8x128xf32>
    %64 = math.absf %63 : vector<8x128xf32>
    %65 = vector.extract_strided_slice %59 {offsets = [0, 512], sizes = [8, 128], strides = [1, 1]} : vector<8x640xf32> to vector<8x128xf32>
    %66 = math.absf %65 : vector<8x128xf32>
    %67 = tpu.concatenate %60, %61, %62, %64, %66 in 0 : vector<8x128xf32>, vector<8x128xf32>, vector<8x128xf32>, vector<8x128xf32>, vector<8x128xf32> -> vector<40x128xf32>
    %68 = arith.truncf %67 : vector<40x128xf32> to vector<40x128xbf16>
    %cst_24 = arith.constant dense<0.000000e+00> : vector<8x128xf32>
    %69 = tpu.matmul %57, %68, %cst_24 {dimension_numbers = #tpu.dot_dimension_numbers<[1], [0], [0], [1], [0, 0, 1, 1], [], []>} : vector<8x40xbf16>, vector<40x128xbf16>, vector<8x128xf32> -> vector<8x128xf32>
    %70 = vector.extract_strided_slice %55 {offsets = [0, 128], sizes = [8, 128], strides = [1, 1]} : vector<8x256xbf16> to vector<8x128xbf16>
    %cst_25 = arith.constant dense<0.000000e+00> : vector<8x640xf32>
    %71 = tpu.matmul %70, %0, %cst_25 {dimension_numbers = #tpu.dot_dimension_numbers<[1], [0], [0], [1], [0, 0, 1, 1], [], []>} : vector<8x128xbf16>, vector<128x640xbf16>, vector<8x640xf32> -> vector<8x640xf32>
    %72 = vector.extract_strided_slice %71 {offsets = [0, 0], sizes = [8, 128], strides = [1, 1]} : vector<8x640xf32> to vector<8x128xf32>
    %73 = vector.extract_strided_slice %71 {offsets = [0, 128], sizes = [8, 128], strides = [1, 1]} : vector<8x640xf32> to vector<8x128xf32>
    %74 = vector.extract_strided_slice %71 {offsets = [0, 256], sizes = [8, 128], strides = [1, 1]} : vector<8x640xf32> to vector<8x128xf32>
    %75 = vector.extract_strided_slice %71 {offsets = [0, 384], sizes = [8, 128], strides = [1, 1]} : vector<8x640xf32> to vector<8x128xf32>
    %76 = math.absf %75 : vector<8x128xf32>
    %77 = vector.extract_strided_slice %71 {offsets = [0, 512], sizes = [8, 128], strides = [1, 1]} : vector<8x640xf32> to vector<8x128xf32>
    %78 = math.absf %77 : vector<8x128xf32>
    %79 = tpu.concatenate %72, %73, %74, %76, %78 in 0 : vector<8x128xf32>, vector<8x128xf32>, vector<8x128xf32>, vector<8x128xf32>, vector<8x128xf32> -> vector<40x128xf32>
    %80 = arith.truncf %79 : vector<40x128xf32> to vector<40x128xbf16>
    %cst_26 = arith.constant dense<0.000000e+00> : vector<8x128xf32>
    %81 = tpu.matmul %57, %80, %cst_26 {dimension_numbers = #tpu.dot_dimension_numbers<[1], [0], [0], [1], [0, 0, 1, 1], [], []>} : vector<8x40xbf16>, vector<40x128xbf16>, vector<8x128xf32> -> vector<8x128xf32>
    %82 = tpu.concatenate %69, %81 in 1 : vector<8x128xf32>, vector<8x128xf32> -> vector<8x256xf32>
    %83 = arith.addf %82, %27 : vector<8x256xf32>
    %cst_27 = arith.constant 0.000000e+00 : f32
    %84 = vector.broadcast %cst_27 : f32 to vector<8x256xf32>
    %85 = arith.maximumf %83, %84 : vector<8x256xf32>
    %c0_28 = arith.constant 0 : index
    %c0_29 = arith.constant 0 : index
    %86 = vector.load %arg6[%c0_28, %c0_29] : memref<8x256xf32, #tpu.memory_space<vmem>>, vector<8x256xf32>
    tpu.vector_store %arg6[%c0_28, %c0_29], %85 {strides = array<i32>} : memref<8x256xf32, #tpu.memory_space<vmem>>, vector<8x256xf32>,
    return
  }
}

</mosaic_0001>

<bundles_post_ra>
// kernel: tpu_custom_call.1
= control target key start
LH: loop header
LB: loop body
LE: loop exit
PB: predicated region body
PF: predicated region fallthrough
CT: control target
= control target key end

     0   :  { %11 = vsyncpa [#allocation3], 0  ;;  %s1806_s0 = inlined_call_operand.vmem [shape: bf16[8,256], index: 0, kind: input, shape index: {}]   ;;  %s1807_s1 = inlined_call_operand.hbm [shape: bf16[128,640], index: 1, kind: input, shape index: {}]   ;;  %s1808_s2 = inlined_call_operand.vmem [shape: bf16[8,40], index: 2, kind: input, shape index: {}]   ;;  %s1809_s3 = inlined_call_operand.vmem [shape: bf16[1,8,40], index: 3, kind: input, shape index: {}]   ;;  %s1810_s4 = inlined_call_operand.vmem [shape: f32[1,8,1], index: 4, kind: input, shape index: {}]   ;;  %s1811_s5 = inlined_call_operand.vmem [shape: f32[1,8,1], index: 5, kind: input, shape index: {}]   ;;  %s1812_s6 = inlined_call_operand.hbm [shape: f32[8,256], index: 6, kind: output, shape index: {}]  }
   0x1   :  { %12 = vsyncpa [#allocation4], 0  ;;  %s1381_s21 = smov [#allocation2]   ;;  %s1333_s25 = scalar_lea.hbm %s1807_s1, 5120 }
   0x2   :  { %s20_s22 = sshll.u32 %s1381_s21, 4  ;;  %p1334_p0 = scmp.ne.s32.totalorder %s1807_s1, %s1333_s25  ;;  %s21_s22 = int_to_ptr.vmem [resolvable:$true] %s20_s22 }
   0x3   :  { %p1337_p1 = scmp.lt.u32.totalorder %s1333_s25, %s1807_s1 }
   0x5   :  { %p1339_p2 = pnand %p1337_p1, %p1334_p0 }
   0x7   :  { %1342 = shalt.err (!%p1339_p2)
}
   0x8   :  { %s1343_s30 = scalar_lea.vmem %s21_s22, 5120  ;;  %p1348_p4 = scmp.lt.s32.totalorder %s21_s22, %s21_s22 }
   0x9   :  { %p1344_p3 = scmp.ne.s32.totalorder %s21_s22, %s1343_s30  ;;  %p1349_p5 = scmp.lt.s32.totalorder %s1343_s30, %s1343_s30 }
   0xb   :  { %p1350_p6 = por %p1349_p5, %p1348_p4 }
   0xd   :  { %p1351_p7 = pnand %p1350_p6, %p1344_p3 }
   0xf   :  { %1354 = shalt.err (!%p1351_p7)
}
  0x10   :  { %s1382_s7 = smov 320   ;;  %s1383_s8 = smov 20  }
  0x11   :  { %26 = dma.hbm_to_vmem [thread:$0]  %s1807_s1, 5120, %s21_s22, [#allocation3], %s1382_s7, %s1382_s7, %s1383_s8  }
  0x12   :  { %1377 = dma.done.wait [#allocation3], 5120  }
  0x13   :  { %1378 = vsyncadd [#allocation3], 4294962176  ;;  %v1384_v0 = vmov 0   ;;  %v1439_v1 = vld [vmem:[#allocation2 + $0x4] ss:$20 sps:$4 sm:$0xff]   ;;  %v1385_v32 = vmov 0.0  }
  0x14   :  { %329 = vmatprep.mubr.bf16.mxu0 %v1384_v0  ;;  %370 = vmatprep.mubr.bf16.mxu1 %v1384_v0  ;;  %v1441_v2 = vld [vmem:[#allocation2] ss:$20 sps:$4 sm:$0xff]   ;;  %v1447_v4 = vld [vmem:[#allocation2 + $0x28] ss:$20 sps:$4 sm:$0xff]   ;;  %v1453_v6 = vld [vmem:[#allocation2 + $0x50] ss:$20 sps:$4 sm:$0xff]  }
  0x15   :  { %1272 = vset.pattern.permute.xlu1 %v1384_v0  ;;  %1273 = vset.pattern.permute.xlu0 %v1384_v0  ;;  %v1444_v3 = vld [vmem:[#allocation2 + $0x2c] ss:$20 sps:$4 sm:$0xff]   ;;  %v1450_v5 = vld [vmem:[#allocation2 + $0x54] ss:$20 sps:$4 sm:$0xff]   ;;  %v1456_v7 = vld [vmem:[#allocation2 + $0x7c] ss:$20 sps:$4 sm:$0xff]  }
  0x16   :  { %297 = vmatprep.subr.bf16.mxu0 %v1439_v1  ;;  %v1458_v8 = vld [vmem:[#allocation2 + $0xc] ss:$20 sps:$4 sm:$0xff]   ;;  %v1460_v9 = vld [vmem:[#allocation2 + $0x8] ss:$20 sps:$4 sm:$0xff]   ;;  %v1465_v11 = vld [vmem:[#allocation2 + $0xa4] ss:$20 sps:$4 sm:$0xff]  }
  0x17   :  { %298 = vmatpush1.bf16.msra.mxu0 %v1441_v2  ;;  %v1463_v10 = vld [vmem:[#allocation2 + $0x78] ss:$20 sps:$4 sm:$0xff]   ;;  %338 = vmatprep.subr.bf16.mxu1 %v1458_v8  ;;  %v1469_v12 = vld [vmem:[#allocation2 + $0x34] ss:$20 sps:$4 sm:$0xff]   ;;  %v1472_v13 = vld [vmem:[#allocation2 + $0x30] ss:$20 sps:$4 sm:$0xff]  }
  0x18   :  { %299 = vmatprep.subr.bf16.mxu0 %v1444_v3  ;;  %339 = vmatpush1.bf16.msra.mxu1 %v1460_v9  ;;  %v1475_v14 = vld [vmem:[#allocation2 + $0x5c] ss:$20 sps:$4 sm:$0xff]   ;;  %v1478_v15 = vld [vmem:[#allocation2 + $0xa0] ss:$20 sps:$4 sm:$0xff]   ;;  %v1484_v17 = vld [vmem:[#allocation2 + $0x58] ss:$20 sps:$4 sm:$0xff]  }
  0x19   :  { %340 = vmatprep.subr.bf16.mxu1 %v1469_v12  ;;  %v1481_v16 = vld [vmem:[#allocation2 + $0xcc] ss:$20 sps:$4 sm:$0xff]   ;;  %v1487_v18 = vld [vmem:[#allocation2 + $0x84] ss:$20 sps:$4 sm:$0xff]   ;;  %v1490_v19 = vld [vmem:[#allocation2 + $0xc8] ss:$20 sps:$4 sm:$0xff]  }
  0x1a   :  { %v1493_v20 = vld [vmem:[#allocation2 + $0xf4] ss:$20 sps:$4 sm:$0xff]   ;;  %v1499_v22 = vld [vmem:[#allocation2 + $0xac] ss:$20 sps:$4 sm:$0xff]   ;;  %v1502_v23 = vld [vmem:[#allocation2 + $0xf0] ss:$20 sps:$4 sm:$0xff]  }
  0x1b   :  { %300 = vmatpush1.bf16.msra.mxu0 %v1447_v4  ;;  %v1496_v21 = vld [vmem:[#allocation2 + $0x80] ss:$20 sps:$4 sm:$0xff]   ;;  %v1505_v24 = vld [vmem:[#allocation2 + $0x11c] ss:$20 sps:$4 sm:$0xff]   ;;  %v1514_v27 = vld [vmem:[#allocation2 + $0x118] ss:$20 sps:$4 sm:$0xff]  }
  0x1c   :  { %301 = vmatprep.subr.bf16.mxu0 %v1450_v5  ;;  %341 = vmatpush1.bf16.msra.mxu1 %v1472_v13  ;;  %v1508_v25 = vld [vmem:[#allocation2 + $0xa8] ss:$20 sps:$4 sm:$0xff]   ;;  %v1518_v28 = vld [vmem:[#allocation2 + $0xd0] ss:$20 sps:$4 sm:$0xff]   ;;  %v1531_v33 = vld [vmem:[#allocation2 + $0xf8] ss:$20 sps:$4 sm:$0xff]  }
  0x1d   :  { %342 = vmatprep.subr.bf16.mxu1 %v1475_v14  ;;  %v1511_v26 = vld [vmem:[#allocation2 + $0xd4] ss:$20 sps:$4 sm:$0xff]   ;;  %v1521_v29 = vld [vmem:[#allocation2 + $0xfc] ss:$20 sps:$4 sm:$0xff]   ;;  %v87_v30 = vld [vmem:[%s1806_s0] sm:$0xff]  ;;  %vm1386_vm0 = vmmov 0  }
  0x1e   :  { %v1527_v31 = vld [vmem:[#allocation2 + $0x10] ss:$20 sps:$4 sm:$0xff]   ;;  %v1537_v35 = vld [vmem:[#allocation2 + $0x38] ss:$20 sps:$4 sm:$0xff]   ;;  %v1543_v36 = vld [vmem:[#allocation2 + $0x120] ss:$20 sps:$4 sm:$0xff]   ;;  %v1593_v43 = vcombine.high %v87_v30, %v87_v30 }
  0x1f   :  { %302 = vmatpush1.bf16.msra.mxu0 %v1453_v6  ;;  %v1534_v34 = vld [vmem:[#allocation2 + $0x124] ss:$20 sps:$4 sm:$0xff]   ;;  %v1547_v37 = vld [vmem:[#allocation2 + $0x60] ss:$20 sps:$4 sm:$0xff]   ;;  %v1553_v38 = vld [vmem:[#allocation2 + $0x88] ss:$20 sps:$4 sm:$0xff]  }
  0x20   :  { %303 = vmatprep.subr.bf16.mxu0 %v1456_v7  ;;  %343 = vmatpush1.bf16.msra.mxu1 %v1484_v17  ;;  %v1559_v39 = vld [vmem:[#allocation2 + $0xb0] ss:$20 sps:$4 sm:$0xff]   ;;  %v1563_v40 = vld [vmem:[#allocation2 + $0xd8] ss:$20 sps:$4 sm:$0xff]   ;;  %v1567_v41 = vld [vmem:[#allocation2 + $0x100] ss:$20 sps:$4 sm:$0xff]  }
  0x21   :  { %344 = vmatprep.subr.bf16.mxu1 %v1487_v18  ;;  %v1571_v42 = vld [vmem:[#allocation2 + $0x128] ss:$20 sps:$4 sm:$0xff]   ;;  %vm428_vm1 = vcmask 1043456   ;;  %v1604_v62 = vld [vmem:[%s1808_s2] sm:$0xf]  ;;  %vm424_vm2 = vcmask 326656  }
  0x23   :  { %304 = vmatpush1.bf16.msra.mxu0 %v1463_v10 }
  0x24   :  { %305 = vmatprep.subr.bf16.mxu0 %v1465_v11  ;;  %345 = vmatpush1.bf16.msra.mxu1 %v1496_v21 }
  0x25   :  { %346 = vmatprep.subr.bf16.mxu1 %v1499_v22 }
  0x27   :  { %306 = vmatpush1.bf16.msra.mxu0 %v1478_v15 }
  0x28   :  { %307 = vmatprep.subr.bf16.mxu0 %v1481_v16  ;;  %347 = vmatpush1.bf16.msra.mxu1 %v1508_v25 }
  0x29   :  { %348 = vmatprep.subr.bf16.mxu1 %v1511_v26 }
  0x2b   :  { %308 = vmatpush1.bf16.msra.mxu0 %v1490_v19 }
  0x2c   :  { %309 = vmatprep.subr.bf16.mxu0 %v1493_v20  ;;  %349 = vmatpush1.bf16.msra.mxu1 %v1518_v28 }
  0x2d   :  { %350 = vmatprep.subr.bf16.mxu1 %v1521_v29 }
  0x2f   :  { %310 = vmatpush1.bf16.msra.mxu0 %v1502_v23 }
  0x30   :  { %311 = vmatprep.subr.bf16.mxu0 %v1505_v24  ;;  %351 = vmatpush1.bf16.msra.mxu1 %v1531_v33 }
  0x31   :  { %352 = vmatprep.subr.bf16.mxu1 %v1534_v34 }
  0x33   :  { %312 = vmatpush1.bf16.msra.mxu0 %v1514_v27 }
  0x34   :  { %1145 = vmatprep.subr.bf16.mxu0 %v1385_v32  ;;  %353 = vmatpush1.bf16.msra.mxu1 %v1543_v36 }
  0x35   :  { %1165 = vmatprep.subr.bf16.mxu1 %v1385_v32 }
  0x36   :  { %330 = vmatmul.mubr.bf16.vlgmr.msra.gmra.mrb[0].mxu0 %v87_v30 }
  0x37   :  { %1146 = vmatpush3.bf16.msra.mxu0 %v1527_v31  ;;  %1161 = vmatprep.mubr.msk.bf16.mxu0 %vm1386_vm0, %v1385_v32 }
  0x38   :  { %1147 = vmatprep.subr.bf16.mxu0 %v1385_v32  ;;  %371 = vmatmul.mubr.bf16.vlgmr.msra.gmra.mrb[0].mxu1 %v87_v30 }
  0x39   :  { %1171 = vmatprep.mubr.msk.bf16.mxu1 %vm1386_vm0, %v1385_v32 }
  0x3b   :  { %1148 = vmatpush3.bf16.msra.mxu0 %v1537_v35 }
  0x3c   :  { %1149 = vmatprep.subr.bf16.mxu0 %v1385_v32 }
  0x3f   :  { %1150 = vmatpush3.bf16.msra.mxu0 %v1547_v37 }
  0x40   :  { %1151 = vmatprep.subr.bf16.mxu0 %v1385_v32 }
  0x43   :  { %1152 = vmatpush3.bf16.msra.mxu0 %v1553_v38 }
  0x44   :  { %1153 = vmatprep.subr.bf16.mxu0 %v1385_v32 }
  0x47   :  { %1154 = vmatpush3.bf16.msra.mxu0 %v1559_v39 }
  0x48   :  { %1155 = vmatprep.subr.bf16.mxu0 %v1385_v32 }
  0x4b   :  { %1156 = vmatpush3.bf16.msra.mxu0 %v1563_v40 }
  0x4c   :  { %1157 = vmatprep.subr.bf16.mxu0 %v1385_v32 }
  0x4f   :  { %1158 = vmatpush3.bf16.msra.mxu0 %v1567_v41 }
  0x50   :  { %1159 = vmatprep.subr.bf16.mxu0 %v1385_v32 }
  0x53   :  { %1160 = vmatpush3.bf16.msra.mxu0 %v1571_v42 }
  0x54   :  { %517 = vmatprep.subr.bf16.mxu0 %v1458_v8 }
  0x56   :  { %1162 = vmatmul.mubr.bf16.vlgmr.msra.gmra.mrb[4].mxu0 %v87_v30 }
  0x57   :  { %518 = vmatpush1.bf16.msra.mxu0 %v1460_v9  ;;  %549 = vmatprep.mubr.bf16.mxu0 %v1384_v0 }
  0x58   :  { %519 = vmatprep.subr.bf16.mxu0 %v1469_v12 }
  0x5b   :  { %520 = vmatpush1.bf16.msra.mxu0 %v1472_v13 }
  0x5c   :  { %521 = vmatprep.subr.bf16.mxu0 %v1475_v14 }
  0x5f   :  { %522 = vmatpush1.bf16.msra.mxu0 %v1484_v17 }
  0x60   :  { %523 = vmatprep.subr.bf16.mxu0 %v1487_v18 }
  0x63   :  { %524 = vmatpush1.bf16.msra.mxu0 %v1496_v21 }
  0x64   :  { %525 = vmatprep.subr.bf16.mxu0 %v1499_v22 }
  0x67   :  { %526 = vmatpush1.bf16.msra.mxu0 %v1508_v25 }
  0x68   :  { %527 = vmatprep.subr.bf16.mxu0 %v1511_v26 }
  0x6b   :  { %528 = vmatpush1.bf16.msra.mxu0 %v1518_v28 }
  0x6c   :  { %529 = vmatprep.subr.bf16.mxu0 %v1521_v29 }
  0x6f   :  { %530 = vmatpush1.bf16.msra.mxu0 %v1531_v33 }
  0x70   :  { %531 = vmatprep.subr.bf16.mxu0 %v1534_v34 }
  0x73   :  { %532 = vmatpush1.bf16.msra.mxu0 %v1543_v36 }
  0x74   :  { %1195 = vmatprep.subr.bf16.mxu0 %v1385_v32 }
  0x76   :  { %550 = vmatmul.mubr.bf16.vlgmr.msra.gmra.mrb[8].mxu0 %v1593_v43 }
  0x77   :  { %1201 = vmatprep.mubr.msk.bf16.mxu0 %vm1386_vm0, %v1385_v32 }
 0x109   :  { %v331_v44 = vpop.f32.mrb[0].mxu0 }
 0x10a   :  { %v333_v45 = vpop.f32.mrb[1].mxu0 }
 0x10b   :  { %v421_v46 = vpack.c.bf16 %v333_v45, %v331_v44  ;;  %v335_v47 = vpop.f32.mrb[2].mxu0  ;;  %v372_v49 = vpop.f32.mrb[0].mxu1 }
 0x10c   :  { %v336_v48 = vpop.f32.mrb[3].mxu0  ;;  %v374_v50 = vpop.f32.mrb[1].mxu1 }
 0x10d   :  { %1166 = vmatpush3.bf16.msra.mxu1 %v421_v46  ;;  %v419_v51 = vand.u32 2147483647, %v374_v50  ;;  %v376_v52 = vpop.f32.mrb[2].mxu1 }
 0x10e   :  { %1167 = vmatprep.subr.bf16.mxu1 %v1385_v32  ;;  %v377_v53 = vpop.f32.mrb[3].mxu1 }
 0x10f   :  { %v422_v54 = vpack.c.bf16 %v419_v51, %v372_v49 }
 0x111   :  { %1168 = vmatpush3.bf16.msra.mxu1 %v422_v54 }
 0x112   :  { %1169 = vmatprep.subr.bf16.mxu1 %v1385_v32 }
 0x129   :  { %v413_v55 = vpop.f32.mrb[4].mxu0 }
 0x12a   :  { %v420_v56 = vand.u32 2147483647, %v413_v55  ;;  %v1163_v57 = vpop.f32.mrb[5].mxu0 }
 0x12b   :  { %v416_v58 = vpop.f32.mrb[6].mxu0 }
 0x12c   :  { %v423_v59 = vpack.c.bf16 %v420_v56, %v420_v56  ;;  %v1164_v60 = vpop.f32.mrb[7].mxu0 }
 0x12e   :  { %v430_v61 = vsel %vm428_vm1, %v423_v59, 0 }
 0x12f   :  { %1170 = vmatpush3.bf16.msra.mxu1 %v430_v61 }
 0x130   :  { %476 = vmatprep.subr.bf16.mxu1 %v1439_v1 }
 0x132   :  { %1172 = vmatmul.mubr.msk.bf16.vlgmr.msra.gmra.mrb[4].mxu1 %vm424_vm2, %v1604_v62 }
 0x133   :  { %477 = vmatpush1.bf16.msra.mxu1 %v1441_v2  ;;  %508 = vmatprep.mubr.bf16.mxu1 %v1384_v0 }
 0x134   :  { %478 = vmatprep.subr.bf16.mxu1 %v1444_v3 }
 0x137   :  { %479 = vmatpush1.bf16.msra.mxu1 %v1447_v4 }
 0x138   :  { %480 = vmatprep.subr.bf16.mxu1 %v1450_v5 }
 0x13b   :  { %481 = vmatpush1.bf16.msra.mxu1 %v1453_v6 }
 0x13c   :  { %482 = vmatprep.subr.bf16.mxu1 %v1456_v7 }
 0x13f   :  { %483 = vmatpush1.bf16.msra.mxu1 %v1463_v10 }
 0x140   :  { %484 = vmatprep.subr.bf16.mxu1 %v1465_v11 }
 0x143   :  { %485 = vmatpush1.bf16.msra.mxu1 %v1478_v15 }
 0x144   :  { %486 = vmatprep.subr.bf16.mxu1 %v1481_v16 }
 0x147   :  { %487 = vmatpush1.bf16.msra.mxu1 %v1490_v19 }
 0x148   :  { %488 = vmatprep.subr.bf16.mxu1 %v1493_v20 }
 0x149   :  { %v551_v63 = vpop.f32.mrb[8].mxu0 }
 0x14a   :  { %v553_v30 = vpop.f32.mrb[9].mxu0 }
 0x14b   :  { %489 = vmatpush1.bf16.msra.mxu1 %v1502_v23  ;;  %v555_v44 = vpop.f32.mrb[10].mxu0 }
 0x14c   :  { %490 = vmatprep.subr.bf16.mxu1 %v1505_v24  ;;  %v556_v45 = vpop.f32.mrb[11].mxu0 }
 0x14f   :  { %491 = vmatpush1.bf16.msra.mxu1 %v1514_v27 }
 0x150   :  { %1175 = vmatprep.subr.bf16.mxu1 %v1385_v32 }
 0x152   :  { %509 = vmatmul.mubr.bf16.vlgmr.msra.gmra.mrb[8].mxu1 %v1593_v43 }
 0x153   :  { %1176 = vmatpush3.bf16.msra.mxu1 %v1527_v31  ;;  %1191 = vmatprep.mubr.msk.bf16.mxu1 %vm1386_vm0, %v1385_v32 }
 0x154   :  { %1177 = vmatprep.subr.bf16.mxu1 %v1385_v32 }
 0x157   :  { %1178 = vmatpush3.bf16.msra.mxu1 %v1537_v35 }
 0x158   :  { %1179 = vmatprep.subr.bf16.mxu1 %v1385_v32 }
 0x15b   :  { %1180 = vmatpush3.bf16.msra.mxu1 %v1547_v37 }
 0x15c   :  { %1181 = vmatprep.subr.bf16.mxu1 %v1385_v32 }
 0x15f   :  { %1182 = vmatpush3.bf16.msra.mxu1 %v1553_v38 }
 0x160   :  { %1183 = vmatprep.subr.bf16.mxu1 %v1385_v32 }
 0x163   :  { %1184 = vmatpush3.bf16.msra.mxu1 %v1559_v39 }
 0x164   :  { %1185 = vmatprep.subr.bf16.mxu1 %v1385_v32 }
 0x167   :  { %1186 = vmatpush3.bf16.msra.mxu1 %v1563_v40 }
 0x168   :  { %1187 = vmatprep.subr.bf16.mxu1 %v1385_v32 }
 0x16b   :  { %1188 = vmatpush3.bf16.msra.mxu1 %v1567_v41 }
 0x16c   :  { %1189 = vmatprep.subr.bf16.mxu1 %v1385_v32 }
 0x16f   :  { %1190 = vmatpush3.bf16.msra.mxu1 %v1571_v42 }
 0x170   :  { %725 = vmatprep.subr.bf16.mxu1 %v1458_v8 }
 0x172   :  { %1192 = vmatmul.mubr.bf16.vlgmr.msra.gmra.mrb[12].mxu1 %v1593_v43  ;;  %v598_v43 = vand.u32 2147483647, %v553_v30 }
 0x173   :  { %726 = vmatpush1.bf16.msra.mxu1 %v1460_v9  ;;  %757 = vmatprep.mubr.bf16.mxu1 %v1384_v0 }
 0x174   :  { %727 = vmatprep.subr.bf16.mxu1 %v1469_v12  ;;  %v601_v46 = vpack.c.bf16 %v598_v43, %v551_v63 }
 0x177   :  { %728 = vmatpush1.bf16.msra.mxu1 %v1472_v13 }
 0x178   :  { %729 = vmatprep.subr.bf16.mxu1 %v1475_v14 }
 0x17b   :  { %730 = vmatpush1.bf16.msra.mxu1 %v1484_v17 }
 0x17c   :  { %731 = vmatprep.subr.bf16.mxu1 %v1487_v18 }
 0x17f   :  { %732 = vmatpush1.bf16.msra.mxu1 %v1496_v21 }
 0x180   :  { %733 = vmatprep.subr.bf16.mxu1 %v1499_v22 }
 0x183   :  { %734 = vmatpush1.bf16.msra.mxu1 %v1508_v25 }
 0x184   :  { %735 = vmatprep.subr.bf16.mxu1 %v1511_v26 }
 0x187   :  { %736 = vmatpush1.bf16.msra.mxu1 %v1518_v28 }
 0x188   :  { %737 = vmatprep.subr.bf16.mxu1 %v1521_v29 }
 0x18b   :  { %738 = vmatpush1.bf16.msra.mxu1 %v1531_v33 }
 0x18c   :  { %739 = vmatprep.subr.bf16.mxu1 %v1534_v34 }
 0x18f   :  { %740 = vmatpush1.bf16.msra.mxu1 %v1543_v36 }
 0x190   :  { %1225 = vmatprep.subr.bf16.mxu1 %v1385_v32 }
 0x205   :  { %v1663_v47 = vpop.f32.mrb[4].mxu1 }
 0x206   :  { %v1173_v48 = vpop.f32.mrb[5].mxu1  ;;  %v648_v30 = vmax.f32 %v1663_v47, 0.0 }
 0x207   :  { %v469_v49 = vpop.f32.mrb[6].mxu1 }
 0x208   :  { %v1174_v50 = vpop.f32.mrb[7].mxu1 }
 0x209   :  { %v653_v50 = vmul.f32 %v648_v30, %v648_v30 }
 0x225   :  { %v510_v51 = vpop.f32.mrb[8].mxu1 }
 0x226   :  { %v512_v52 = vpop.f32.mrb[9].mxu1 }
 0x227   :  { %v600_v53 = vpack.c.bf16 %v512_v52, %v510_v51  ;;  %v514_v54 = vpop.f32.mrb[10].mxu1 }
 0x228   :  { %v515_v55 = vpop.f32.mrb[11].mxu1 }
 0x229   :  { %1196 = vmatpush3.bf16.msra.mxu0 %v600_v53 }
 0x22a   :  { %1197 = vmatprep.subr.bf16.mxu0 %v1385_v32 }
 0x22d   :  { %1198 = vmatpush3.bf16.msra.mxu0 %v601_v46 }
 0x22e   :  { %1199 = vmatprep.subr.bf16.mxu0 %v1385_v32 }
 0x245   :  { %v592_v56 = vpop.f32.mrb[12].mxu1 }
 0x246   :  { %v599_v57 = vand.u32 2147483647, %v592_v56  ;;  %v1193_v58 = vpop.f32.mrb[13].mxu1 }
 0x247   :  { %v595_v59 = vpop.f32.mrb[14].mxu1 }
 0x248   :  { %v602_v60 = vpack.c.bf16 %v599_v57, %v599_v57  ;;  %v1194_v61 = vpop.f32.mrb[15].mxu1  ;;  %v646_v59 = vld [vmem:[%s1810_s4] sm:$0xff] }
 0x24a   :  { %v604_v63 = vsel %vm428_vm1, %v602_v60, 0 }
 0x24b   :  { %1200 = vmatpush3.bf16.msra.mxu0 %v604_v63  ;;  %v647_v63 = vld [vmem:[%s1811_s5] sm:$0xff] }
 0x24c   :  { %684 = vmatprep.subr.bf16.mxu0 %v1439_v1 }
 0x24e   :  { %1202 = vmatmul.mubr.msk.bf16.vlgmr.msra.gmra.mrb[12].mxu0 %vm424_vm2, %v1604_v62 }
 0x24f   :  { %685 = vmatpush1.bf16.msra.mxu0 %v1441_v2  ;;  %716 = vmatprep.mubr.bf16.mxu0 %v1384_v0 }
 0x250   :  { %686 = vmatprep.subr.bf16.mxu0 %v1444_v3 }
 0x253   :  { %687 = vmatpush1.bf16.msra.mxu0 %v1447_v4 }
 0x254   :  { %688 = vmatprep.subr.bf16.mxu0 %v1450_v5 }
 0x257   :  { %689 = vmatpush1.bf16.msra.mxu0 %v1453_v6 }
 0x258   :  { %690 = vmatprep.subr.bf16.mxu0 %v1456_v7 }
 0x25b   :  { %691 = vmatpush1.bf16.msra.mxu0 %v1463_v10 }
 0x25c   :  { %692 = vmatprep.subr.bf16.mxu0 %v1465_v11 }
 0x25f   :  { %693 = vmatpush1.bf16.msra.mxu0 %v1478_v15 }
 0x260   :  { %694 = vmatprep.subr.bf16.mxu0 %v1481_v16 }
 0x263   :  { %695 = vmatpush1.bf16.msra.mxu0 %v1490_v19 }
 0x264   :  { %696 = vmatprep.subr.bf16.mxu0 %v1493_v20 }
 0x267   :  { %697 = vmatpush1.bf16.msra.mxu0 %v1502_v23 }
 0x268   :  { %698 = vmatprep.subr.bf16.mxu0 %v1505_v24 }
 0x26b   :  { %699 = vmatpush1.bf16.msra.mxu0 %v1514_v27 }
 0x26c   :  { %1205 = vmatprep.subr.bf16.mxu0 %v1385_v32 }
 0x321   :  { %v1688_v62 = vpop.f32.mrb[12].mxu0 }
 0x322   :  { %v649_v43 = vmax.f32 %v1688_v62, 0.0  ;;  %v1203_v44 = vpop.f32.mrb[13].mxu0 }
 0x323   :  { %v643_v45 = vpop.f32.mrb[14].mxu0 }
 0x324   :  { %v1204_v46 = vpop.f32.mrb[15].mxu0  ;;  %v650_v48 = vadd.f32 %v649_v43, %v648_v30  ;;  %v654_v49 = vmul.f32 %v649_v43, %v649_v43 }
 0x326   :  { %651 = vadd.xlane.f32.xlu0 %v650_v48  ;;  %v655_v51 = vadd.f32 %v654_v49, %v653_v50 }
 0x32a   :  { %656 = vadd.xlane.f32.xlu0 %v655_v51 }
 0x3b3   :  { %v652_v52 = vpop.xlane.xlu0 %651 }
 0x3b4   :  { %v658_v53 = vmul.f32 0.015625, %v652_v52 }
 0x3b6   :  { %v660_v55 = vmul.f32 %v658_v53, %v658_v53 }
 0x3b7   :  { %v657_v54 = vpop.xlane.xlu0 %656 }
 0x3b8   :  { %v659_v56 = vmul.f32 0.015625, %v657_v54 }
 0x3ba   :  { %v661_v57 = vsub.f32 %v659_v56, %v660_v55  ;;  %v1746_v55 = vld [vmem:[%s1809_s3] sm:$0xf]  ;;  %s1387_s3 = smov [#allocation5]  }
 0x3bb   :  { %s1039_s16 = sshll.u32 %s1387_s3, 4  ;;  %s1040_s16 = int_to_ptr.vmem [resolvable:$true] %s1039_s16 }
 0x3bc   :  { %v662_v58 = vadd.f32 1e-05, %v661_v57  ;;  %s1355_s17 = scalar_lea.vmem %s1040_s16, 256  ;;  %p1360_p9 = scmp.lt.s32.totalorder %s1040_s16, %s1040_s16 }
 0x3bd   :  { %p1356_p8 = scmp.ne.s32.totalorder %s1040_s16, %s1355_s17  ;;  %p1361_p10 = scmp.lt.s32.totalorder %s1355_s17, %s1355_s17 }
 0x3be   :  { %1331 = vrsqrt.f32 %v662_v58 }
 0x3bf   :  { %p1362_p11 = por %p1361_p10, %p1360_p9 }
 0x3c1   :  { %p1363_p12 = pnand %p1362_p11, %p1356_p8 }
 0x3c8   :  { %v1332_v60 = vpop.eup %1331 }
 0x3c9   :  { %v664_v61 = vmul.f32 %v1332_v60, %v646_v59 }
 0x3cb   :  { %669 = vperm.xlu1 %1272, %v664_v61   ;;  %v665_v44 = vmul.f32 %v664_v61, %v658_v53 }
 0x3cd   :  { %v666_v45 = vsub.f32 %v647_v63, %v665_v44 }
 0x3cf   :  { %676 = vperm.xlu1 %1272, %v666_v45  }
 0x44a   :  { %v670_v46 = vpop.permute.xlu1 %669 }
 0x44b   :  { %v672_v48 = vmul.f32 %v670_v46, %v648_v30  ;;  %v673_v49 = vmul.f32 %v670_v46, %v649_v43 }
 0x44e   :  { %v677_v50 = vpop.permute.xlu1 %676 }
 0x44f   :  { %v679_v51 = vadd.f32 %v677_v50, %v672_v48  ;;  %v680_v52 = vadd.f32 %v677_v50, %v673_v49 }
 0x451   :  { %v681_v54 = vpack.c.bf16 %v679_v51, %v679_v51 }
 0x453   :  { %717 = vmatmul.mubr.bf16.vlgmr.msra.gmra.mrb[16].mxu0 %v681_v54  ;;  %758 = vmatmul.mubr.bf16.vlgmr.msra.gmra.mrb[16].mxu1 %v681_v54 }
 0x454   :  { %1206 = vmatpush3.bf16.msra.mxu0 %v1527_v31  ;;  %1221 = vmatprep.mubr.msk.bf16.mxu0 %vm1386_vm0, %v1385_v32 }
 0x455   :  { %1207 = vmatprep.subr.bf16.mxu0 %v1385_v32  ;;  %1231 = vmatprep.mubr.msk.bf16.mxu1 %vm1386_vm0, %v1385_v32 }
 0x458   :  { %1208 = vmatpush3.bf16.msra.mxu0 %v1537_v35 }
 0x459   :  { %1209 = vmatprep.subr.bf16.mxu0 %v1385_v32 }
 0x45c   :  { %1210 = vmatpush3.bf16.msra.mxu0 %v1547_v37 }
 0x45d   :  { %1211 = vmatprep.subr.bf16.mxu0 %v1385_v32 }
 0x460   :  { %1212 = vmatpush3.bf16.msra.mxu0 %v1553_v38 }
 0x461   :  { %1213 = vmatprep.subr.bf16.mxu0 %v1385_v32 }
 0x464   :  { %1214 = vmatpush3.bf16.msra.mxu0 %v1559_v39 }
 0x465   :  { %1215 = vmatprep.subr.bf16.mxu0 %v1385_v32 }
 0x468   :  { %1216 = vmatpush3.bf16.msra.mxu0 %v1563_v40 }
 0x469   :  { %1217 = vmatprep.subr.bf16.mxu0 %v1385_v32 }
 0x46c   :  { %1218 = vmatpush3.bf16.msra.mxu0 %v1567_v41 }
 0x46d   :  { %1219 = vmatprep.subr.bf16.mxu0 %v1385_v32 }
 0x470   :  { %1220 = vmatpush3.bf16.msra.mxu0 %v1571_v42 }
 0x471   :  { %898 = vmatprep.subr.bf16.mxu0 %v1458_v8  ;;  %v1734_v8 = vpack.c.bf16 %v680_v52, %v680_v52 }
 0x473   :  { %1222 = vmatmul.mubr.bf16.vlgmr.msra.gmra.mrb[20].mxu0 %v681_v54 }
 0x474   :  { %899 = vmatpush1.bf16.msra.mxu0 %v1460_v9  ;;  %930 = vmatprep.mubr.bf16.mxu0 %v1384_v0 }
 0x475   :  { %900 = vmatprep.subr.bf16.mxu0 %v1469_v12 }
 0x478   :  { %901 = vmatpush1.bf16.msra.mxu0 %v1472_v13 }
 0x479   :  { %902 = vmatprep.subr.bf16.mxu0 %v1475_v14 }
 0x47c   :  { %903 = vmatpush1.bf16.msra.mxu0 %v1484_v17 }
 0x47d   :  { %904 = vmatprep.subr.bf16.mxu0 %v1487_v18 }
 0x480   :  { %905 = vmatpush1.bf16.msra.mxu0 %v1496_v21 }
 0x481   :  { %906 = vmatprep.subr.bf16.mxu0 %v1499_v22 }
 0x484   :  { %907 = vmatpush1.bf16.msra.mxu0 %v1508_v25 }
 0x485   :  { %908 = vmatprep.subr.bf16.mxu0 %v1511_v26 }
 0x488   :  { %909 = vmatpush1.bf16.msra.mxu0 %v1518_v28 }
 0x489   :  { %910 = vmatprep.subr.bf16.mxu0 %v1521_v29 }
 0x48c   :  { %911 = vmatpush1.bf16.msra.mxu0 %v1531_v33 }
 0x48d   :  { %912 = vmatprep.subr.bf16.mxu0 %v1534_v34 }
 0x490   :  { %913 = vmatpush1.bf16.msra.mxu0 %v1543_v36 }
 0x491   :  { %1255 = vmatprep.subr.bf16.mxu0 %v1385_v32 }
 0x493   :  { %931 = vmatmul.mubr.bf16.vlgmr.msra.gmra.mrb[24].mxu0 %v1734_v8 }
 0x494   :  { %1261 = vmatprep.mubr.msk.bf16.mxu0 %vm1386_vm0, %v1385_v32 }
 0x526   :  { %v718_v9 = vpop.f32.mrb[16].mxu0  ;;  %v759_v12 = vpop.f32.mrb[16].mxu1 }
 0x527   :  { %v720_v13 = vpop.f32.mrb[17].mxu0  ;;  %v761_v14 = vpop.f32.mrb[17].mxu1 }
 0x528   :  { %v808_v17 = vpack.c.bf16 %v720_v13, %v718_v9  ;;  %v806_v18 = vand.u32 2147483647, %v761_v14  ;;  %v722_v21 = vpop.f32.mrb[18].mxu0  ;;  %v763_v22 = vpop.f32.mrb[18].mxu1 }
 0x529   :  { %v723_v25 = vpop.f32.mrb[19].mxu0  ;;  %v764_v26 = vpop.f32.mrb[19].mxu1 }
 0x52a   :  { %v809_v28 = vpack.c.bf16 %v806_v18, %v759_v12  ;;  %1226 = vmatpush3.bf16.msra.mxu1 %v808_v17 }
 0x52b   :  { %1227 = vmatprep.subr.bf16.mxu1 %v1385_v32 }
 0x52e   :  { %1228 = vmatpush3.bf16.msra.mxu1 %v809_v28 }
 0x52f   :  { %1229 = vmatprep.subr.bf16.mxu1 %v1385_v32 }
 0x546   :  { %v800_v29 = vpop.f32.mrb[20].mxu0 }
 0x547   :  { %v807_v33 = vand.u32 2147483647, %v800_v29  ;;  %v1223_v34 = vpop.f32.mrb[21].mxu0 }
 0x548   :  { %v803_v36 = vpop.f32.mrb[22].mxu0 }
 0x549   :  { %v810_v30 = vpack.c.bf16 %v807_v33, %v807_v33  ;;  %v1224_v43 = vpop.f32.mrb[23].mxu0 }
 0x54b   :  { %v815_v53 = vsel %vm428_vm1, %v810_v30, 0 }
 0x54c   :  { %1230 = vmatpush3.bf16.msra.mxu1 %v815_v53 }
 0x54d   :  { %857 = vmatprep.subr.bf16.mxu1 %v1439_v1 }
 0x54f   :  { %1232 = vmatmul.mubr.msk.bf16.vlgmr.msra.gmra.mrb[20].mxu1 %vm424_vm2, %v1746_v55 }
 0x550   :  { %858 = vmatpush1.bf16.msra.mxu1 %v1441_v2  ;;  %889 = vmatprep.mubr.bf16.mxu1 %v1384_v0 }
 0x551   :  { %859 = vmatprep.subr.bf16.mxu1 %v1444_v3 }
 0x554   :  { %860 = vmatpush1.bf16.msra.mxu1 %v1447_v4 }
 0x555   :  { %861 = vmatprep.subr.bf16.mxu1 %v1450_v5 }
 0x558   :  { %862 = vmatpush1.bf16.msra.mxu1 %v1453_v6 }
 0x559   :  { %863 = vmatprep.subr.bf16.mxu1 %v1456_v7 }
 0x55c   :  { %864 = vmatpush1.bf16.msra.mxu1 %v1463_v10 }
 0x55d   :  { %865 = vmatprep.subr.bf16.mxu1 %v1465_v11 }
 0x560   :  { %866 = vmatpush1.bf16.msra.mxu1 %v1478_v15 }
 0x561   :  { %867 = vmatprep.subr.bf16.mxu1 %v1481_v16 }
 0x564   :  { %868 = vmatpush1.bf16.msra.mxu1 %v1490_v19 }
 0x565   :  { %869 = vmatprep.subr.bf16.mxu1 %v1493_v20 }
 0x566   :  { %v932_v0 = vpop.f32.mrb[24].mxu0 }
 0x567   :  { %v934_v1 = vpop.f32.mrb[25].mxu0 }
 0x568   :  { %v979_v2 = vand.u32 2147483647, %v934_v1  ;;  %870 = vmatpush1.bf16.msra.mxu1 %v1502_v23  ;;  %v936_v3 = vpop.f32.mrb[26].mxu0 }
 0x569   :  { %v937_v4 = vpop.f32.mrb[27].mxu0  ;;  %871 = vmatprep.subr.bf16.mxu1 %v1505_v24 }
 0x56a   :  { %v982_v5 = vpack.c.bf16 %v979_v2, %v932_v0 }
 0x56c   :  { %872 = vmatpush1.bf16.msra.mxu1 %v1514_v27 }
 0x56d   :  { %1235 = vmatprep.subr.bf16.mxu1 %v1385_v32 }
 0x56f   :  { %890 = vmatmul.mubr.bf16.vlgmr.msra.gmra.mrb[24].mxu1 %v1734_v8 }
 0x570   :  { %1236 = vmatpush3.bf16.msra.mxu1 %v1527_v31  ;;  %1251 = vmatprep.mubr.msk.bf16.mxu1 %vm1386_vm0, %v1385_v32 }
 0x571   :  { %1237 = vmatprep.subr.bf16.mxu1 %v1385_v32 }
 0x574   :  { %1238 = vmatpush3.bf16.msra.mxu1 %v1537_v35 }
 0x575   :  { %1239 = vmatprep.subr.bf16.mxu1 %v1385_v32 }
 0x578   :  { %1240 = vmatpush3.bf16.msra.mxu1 %v1547_v37 }
 0x579   :  { %1241 = vmatprep.subr.bf16.mxu1 %v1385_v32 }
 0x57c   :  { %1242 = vmatpush3.bf16.msra.mxu1 %v1553_v38 }
 0x57d   :  { %1243 = vmatprep.subr.bf16.mxu1 %v1385_v32 }
 0x580   :  { %1244 = vmatpush3.bf16.msra.mxu1 %v1559_v39 }
 0x581   :  { %1245 = vmatprep.subr.bf16.mxu1 %v1385_v32 }
 0x584   :  { %1246 = vmatpush3.bf16.msra.mxu1 %v1563_v40 }
 0x585   :  { %1247 = vmatprep.subr.bf16.mxu1 %v1385_v32 }
 0x588   :  { %1248 = vmatpush3.bf16.msra.mxu1 %v1567_v41 }
 0x589   :  { %1249 = vmatprep.subr.bf16.mxu1 %v1385_v32 }
 0x58c   :  { %1250 = vmatpush3.bf16.msra.mxu1 %v1571_v42 }
 0x58f   :  { %1252 = vmatmul.mubr.bf16.vlgmr.msra.gmra.mrb[28].mxu1 %v1734_v8 }
 0x622   :  { %v851_v6 = vpop.f32.mrb[20].mxu1 }
 0x623   :  { %v1027_v7 = vadd.f32 %v851_v6, %v1663_v47  ;;  %v1233_v10 = vpop.f32.mrb[21].mxu1 }
 0x624   :  { %v854_v11 = vpop.f32.mrb[22].mxu1 }
 0x625   :  { %v1029_v15 = vmax.f32 %v1027_v7, 0.0  ;;  %v1234_v16 = vpop.f32.mrb[23].mxu1 }
 0x627   :  { %1031 = vst [vmem:[#allocation5] sm:$0xff] %v1029_v15 }
 0x642   :  { %v891_v19 = vpop.f32.mrb[24].mxu1 }
 0x643   :  { %v893_v20 = vpop.f32.mrb[25].mxu1 }
 0x644   :  { %v981_v23 = vpack.c.bf16 %v893_v20, %v891_v19  ;;  %v895_v24 = vpop.f32.mrb[26].mxu1 }
 0x645   :  { %v896_v27 = vpop.f32.mrb[27].mxu1 }
 0x646   :  { %1256 = vmatpush3.bf16.msra.mxu0 %v981_v23 }
 0x647   :  { %1257 = vmatprep.subr.bf16.mxu0 %v1385_v32 }
 0x64a   :  { %1258 = vmatpush3.bf16.msra.mxu0 %v982_v5 }
 0x64b   :  { %1259 = vmatprep.subr.bf16.mxu0 %v1385_v32 }
 0x662   :  { %v973_v31 = vpop.f32.mrb[28].mxu1 }
 0x663   :  { %v980_v35 = vand.u32 2147483647, %v973_v31  ;;  %v1253_v37 = vpop.f32.mrb[29].mxu1 }
 0x664   :  { %v976_v38 = vpop.f32.mrb[30].mxu1 }
 0x665   :  { %v983_v39 = vpack.c.bf16 %v980_v35, %v980_v35  ;;  %v1254_v40 = vpop.f32.mrb[31].mxu1 }
 0x667   :  { %v985_v41 = vsel %vm428_vm1, %v983_v39, 0 }
 0x668   :  { %1260 = vmatpush3.bf16.msra.mxu0 %v985_v41 }
 0x66b   :  { %1262 = vmatmul.mubr.msk.bf16.vlgmr.msra.gmra.mrb[28].mxu0 %vm424_vm2, %v1746_v55 }
 0x73e   :  { %v1021_v42 = vpop.f32.mrb[28].mxu0 }
 0x73f   :  { %v1028_v47 = vadd.f32 %v1021_v42, %v1688_v62  ;;  %v1263_v56 = vpop.f32.mrb[29].mxu0 }
 0x740   :  { %v1024_v57 = vpop.f32.mrb[30].mxu0 }
 0x741   :  { %v1030_v32 = vmax.f32 %v1028_v47, 0.0  ;;  %v1264_v58 = vpop.f32.mrb[31].mxu0 }
 0x743   :  { %1032 = vst [vmem:[#allocation5 + $0x8] sm:$0xff] %v1030_v32 }
 0x744   :  { %1366 = shalt.err (!%p1363_p12)
}
 0x745   :  { %s1367_s20 = scalar_lea.hbm %s1812_s6, 256 }
 0x746   :  { %p1368_p13 = scmp.ne.s32.totalorder %s1812_s6, %s1367_s20  ;;  %p1371_p0 = scmp.lt.u32.totalorder %s1367_s20, %s1812_s6 }
 0x748   :  { %p1373_p1 = pnand %p1371_p0, %p1368_p13 }
 0x74a   :  { %1376 = shalt.err (!%p1373_p1)
}
 0x74b   :  { %1042 = dma.vmem_to_hbm [thread:$0]  %s1040_s16, 256, %s1812_s6, [#allocation4]  }
 0x74c   :  { %1379 = dma.done.wait [#allocation4], 256  }
 0x74d   :  { %1380 = vsyncadd [#allocation4], 4294967040 }
 0x74e   :  { %1046 = vsyncpa [#allocation3], 1 }
 0x74f   :  { %1047 = vsyncpa [#allocation4], 1 }

</bundles_post_ra>
